<compile_context>
chip_gen: v5e
topology: v5e:2x2
jax: 0.10.0
libtpu: 0.0.40
codegen_flags: <defaults>
</compile_context>

<pallas_src>
import functools

import jax
import jax.numpy as jnp
from jax.experimental import pallas as pl
from jax.experimental.pallas import tpu as pltpu

_LANE = 128
_SUBLANE = 8


def _round_up(n, m):
    return ((n + m - 1) // m) * m


def _pick_batch_tile(batch):
    """Batch (M) tile: as large as possible (<=512 rows), but >=2 tiles when the
    batch is big enough so the 'parallel' axis can shard across 2 TensorCores."""
    if batch <= _SUBLANE:
        return _SUBLANE
    half = _round_up((batch + 1) // 2, _SUBLANE)
    return min(half, 512)


def _fused_mlp_kernel(num_layers, hidden_dim, x_ref, *refs):
    """[Linear + LayerNorm + ReLU] x num_layers + final Linear, fully fused.

    refs = (w_0, ..., w_{L-1}, w_out, vecs, b_out, o_ref)
      w_i   : (K_i, Hp) bf16, zero-padded beyond the true dims
      w_out : (Hp, Op)  bf16
      vecs  : (3L, Hp)  f32, rows [3i, 3i+1, 3i+2] = bias_i, gamma_i, beta_i
      b_out : (1, Op)   f32
    Padded lanes of every intermediate are exactly zero, so LayerNorm statistics
    run over the full padded width with divisor = true hidden_dim (no lane mask).
    """
    o_ref = refs[-1]
    b_out_ref = refs[-2]
    vecs_ref = refs[-3]
    w_out_ref = refs[-4]
    w_refs = refs[:num_layers]

    h = x_ref[...].astype(jnp.float32)
    inv_h = jnp.float32(1.0 / hidden_dim)
    eps = jnp.float32(1e-5)

    for i in range(num_layers):
        b = vecs_ref[3 * i + 0:3 * i + 1, :]      # (1, Hp)
        g = vecs_ref[3 * i + 1:3 * i + 2, :]
        be = vecs_ref[3 * i + 2:3 * i + 3, :]
        # bf16 MXU matmul, f32 accumulate. Padded weight cols / bias lanes are 0,
        # so padded lanes of y are exactly 0.
        y = jnp.dot(h.astype(jnp.bfloat16), w_refs[i][...],
                    preferred_element_type=jnp.float32) + b
        # LayerNorm, f32 stats (required on v5e; eps matches nn.LayerNorm).
        # Padded lanes contribute 0 to both sums -> no mask needed.
        mean = jnp.sum(y, axis=-1, keepdims=True) * inv_h
        var = jnp.sum(y * y, axis=-1, keepdims=True) * inv_h - mean * mean
        var = jnp.maximum(var, 0.0)               # guard E[y^2]-mean^2 round-off
        y_hat = (y - mean) * jax.lax.rsqrt(var + eps) * g + be
        # ReLU; gamma/beta padded lanes are 0 so padded lanes of h stay 0.
        h = jnp.maximum(y_hat, 0.0)
        # TODO(synk): Dropout is identity in eval mode; training-mode dropout
        # would use pltpu.prng_seed / pltpu.prng_random_bits masking here.

    y = jnp.dot(h.astype(jnp.bfloat16), w_out_ref[...],
                preferred_element_type=jnp.float32) + b_out_ref[...]
    o_ref[...] = y.astype(o_ref.dtype)


def init_params(key, input_dim, hidden_dim, num_layers, output_dim):
    """Deterministic f32 parameters mirroring the PyTorch module's shapes."""
    params = {"fc": [], "out": None}
    dims_in = [input_dim] + [hidden_dim] * (num_layers - 1)
    for d_in in dims_in:
        key, k_w, k_b = jax.random.split(key, 3)
        bound = 1.0 / jnp.sqrt(d_in)
        w = jax.random.uniform(k_w, (d_in, hidden_dim), jnp.float32, -bound, bound)
        b = jax.random.uniform(k_b, (1, hidden_dim), jnp.float32, -bound, bound)
        gamma = jnp.ones((1, hidden_dim), jnp.float32)
        beta = jnp.zeros((1, hidden_dim), jnp.float32)
        params["fc"].append((w, b, gamma, beta))
    key, k_w, k_b = jax.random.split(key, 3)
    bound = 1.0 / jnp.sqrt(hidden_dim)
    w_out = jax.random.uniform(k_w, (hidden_dim, output_dim), jnp.float32, -bound, bound)
    b_out = jax.random.uniform(k_b, (1, output_dim), jnp.float32, -bound, bound)
    params["out"] = (w_out, b_out)
    return params


def pack_params(params):
    """Pack parameters for the kernel.

    Weights -> bf16 with N (and K, except layer 0) zero-padded to 128-multiples.
    Per-layer (bias, gamma, beta) -> single (3L, Hp) f32 array (one BlockSpec /
    DMA instead of 3L tiny inputs). Out bias -> (1, Op) f32.
    """
    fc = params["fc"]
    hidden_dim = fc[0][0].shape[1]
    hp = _round_up(hidden_dim, _LANE)

    weights, vec_rows = [], []
    for li, (w, b, g, be) in enumerate(fc):
        d_in, d_out = w.shape
        kp = d_in if li == 0 else _round_up(d_in, _LANE)   # layer 0 keeps true K
        wp = jnp.zeros((kp, hp), jnp.bfloat16).at[:d_in, :d_out].set(
            w.astype(jnp.bfloat16))
        weights.append(wp)
        for v in (b, g, be):
            vec_rows.append(jnp.zeros((1, hp), jnp.float32).at[:, :d_out].set(v))
    vecs = jnp.concatenate(vec_rows, axis=0)               # (3L, Hp)

    w_out, b_out = params["out"]
    d_in, d_out = w_out.shape
    kp, op = _round_up(d_in, _LANE), _round_up(d_out, _LANE)
    w_out_p = jnp.zeros((kp, op), jnp.bfloat16).at[:d_in, :d_out].set(
        w_out.astype(jnp.bfloat16))
    b_out_p = jnp.zeros((1, op), jnp.float32).at[:, :d_out].set(b_out)
    return {"weights": weights, "vecs": vecs, "w_out": w_out_p, "b_out": b_out_p}


@functools.partial(jax.jit, static_argnames=("hidden_dim", "output_dim"))
def emotion_regression_forward(x, packed, *, hidden_dim, output_dim):
    B, in_dim = x.shape
    weights = list(packed["weights"])
    vecs, w_out, b_out = packed["vecs"], packed["w_out"], packed["b_out"]
    num_layers = len(weights)
    hp = w_out.shape[0]
    out_p = w_out.shape[1]

    tile_b = _pick_batch_tile(B)
    bp = _round_up(B, tile_b)
    if bp != B:                        # batch-only pad (no feature-dim pad of x)
        x = jnp.pad(x, ((0, bp - B), (0, 0)))

    # x rides with its TRUE feature width (last block dim == full array dim).
    in_specs = [pl.BlockSpec((tile_b, in_dim), lambda i: (i, 0))]
    # Grid-resident params: constant (0,0) index map, full-array blocks.
    # TODO(synk): at large hidden dims, single-buffer these via
    # pipeline_mode=pl.Buffered(1); the VMEM budget below assumes 2x buffering.
    const_params = weights + [w_out, vecs, b_out]
    in_specs += [pl.BlockSpec(a.shape, lambda i: (0, 0)) for a in const_params]
    flat_inputs = [x] + const_params

    # Generation-aware VMEM budget: footprint (2x-buffered params + batch tiles
    # + compute temporaries) clamped to ~75% of this chip's physical VMEM.
    def _nbytes(a):
        return int(a.size) * a.dtype.itemsize
    param_bytes = sum(_nbytes(a) for a in const_params)
    io_bytes = 2 * tile_b * (in_dim + out_p) * 4
    compute_bytes = 10 * tile_b * hp * 4
    vmem_needed = 2 * param_bytes + io_bytes + compute_bytes + (2 << 20)
    vmem_cap = 48 << 20                        # safe default for v7x (64 MiB/TC)
    try:
        vmem_cap = int(pltpu.get_tpu_info().vmem_capacity_bytes) * 3 // 4
    except Exception:
        pass
    vmem_limit = int(min(max(vmem_needed, 8 << 20), vmem_cap))

    kernel = functools.partial(_fused_mlp_kernel, num_layers, hidden_dim)
    out = pl.pallas_call(
        kernel,
        out_shape=jax.ShapeDtypeStruct((bp, out_p), jnp.float32),
        grid=(bp // tile_b,),
        in_specs=in_specs,
        out_specs=pl.BlockSpec((tile_b, out_p), lambda i: (i, 0)),
        compiler_params=pltpu.CompilerParams(
            dimension_semantics=("parallel",),
            vmem_limit_bytes=vmem_limit,
        ),
    )(*flat_inputs)

    return out[:B, :output_dim]


def reference_forward(x, params):
    """Pure-JAX f32 reference matching PyTorch eval-mode forward."""
    h = x
    for (w, b, gamma, beta) in params["fc"]:
        y = h @ w + b
        mean = jnp.mean(y, axis=-1, keepdims=True)
        var = jnp.mean((y - mean) ** 2, axis=-1, keepdims=True)
        y = (y - mean) / jnp.sqrt(var + 1e-5) * gamma + beta
        h = jnp.maximum(y, 0.0)
    w_out, b_out = params["out"]
    return h @ w_out + b_out


def reference_forward_bf16(x, params):
    """Reference with the kernel's bf16-matmul / f32-accumulate numerics."""
    h = x
    for (w, b, gamma, beta) in params["fc"]:
        y = jnp.dot(h.astype(jnp.bfloat16), w.astype(jnp.bfloat16),
                    preferred_element_type=jnp.float32) + b
        mean = jnp.mean(y, axis=-1, keepdims=True)
        var = jnp.mean((y - mean) ** 2, axis=-1, keepdims=True)
        y = (y - mean) * jax.lax.rsqrt(var + 1e-5) * gamma + beta
        h = jnp.maximum(y, 0.0)
    w_out, b_out = params["out"]
    return jnp.dot(h.astype(jnp.bfloat16), w_out.astype(jnp.bfloat16),
                   preferred_element_type=jnp.float32) + b_out


if __name__ == "__main__":
    # EmotionRegression(input_dim, hidden_dim, num_layers, output_dim) on [batch, input_dim].
    batch, input_dim, hidden_dim, num_layers, output_dim = 8, 32, 32, 3, 4

    key = jax.random.PRNGKey(0)
    key, k_x = jax.random.split(key)
    x = jax.random.normal(k_x, (batch, input_dim), jnp.float32)

    params = init_params(key, input_dim, hidden_dim, num_layers, output_dim)
    packed = pack_params(params)

    out = emotion_regression_forward(x, packed, hidden_dim=hidden_dim,
                                     output_dim=output_dim)
    out = jax.block_until_ready(out)

    ref_bf16 = reference_forward_bf16(x, params)   # same numerics as the kernel
    ref_f32 = reference_forward(x, params)         # PyTorch-parity f32 reference

    assert out.shape == (batch, output_dim), out.shape
    assert jnp.allclose(out, ref_bf16, atol=5e-3, rtol=5e-3), (
        f"max err vs bf16-matched ref {jnp.max(jnp.abs(out - ref_bf16))}")
    # bf16 weight/activation quantization vs pure-f32 reference -> relaxed tolerance.
    assert jnp.allclose(out, ref_f32, atol=1e-1, rtol=1e-1), (
        f"max err vs f32 ref {jnp.max(jnp.abs(out - ref_f32))}")
    print("KERNEL_OK")
</pallas_src>

<mosaic_0001>
module attributes {stable_mosaic.version = 11 : i64} {
  func.func @_fused_mlp_kernel(%arg0: i32, %arg1: memref<8x32xf32, #tpu.memory_space<vmem>>, %arg2: memref<32x128xbf16, #tpu.memory_space<vmem>>, %arg3: memref<128x128xbf16, #tpu.memory_space<vmem>>, %arg4: memref<128x128xbf16, #tpu.memory_space<vmem>>, %arg5: memref<128x128xbf16, #tpu.memory_space<vmem>>, %arg6: memref<9x128xf32, #tpu.memory_space<vmem>>, %arg7: memref<1x128xf32, #tpu.memory_space<vmem>>, %arg8: memref<8x128xf32, #tpu.memory_space<vmem>>) attributes {dimension_semantics = [#tpu.dimension_semantics<parallel>], iteration_bounds = array<i64: 1>, scalar_prefetch = 0 : i64, scratch_operands = 0 : i64, tpu.core_type = #tpu.core_type<tc>, window_params = [{transform_indices = @transform_0, window_bounds = array<i64: 8, 32>}, {pipeline_mode = #tpu.pipeline_mode<synchronous>, transform_indices = @transform_1, window_bounds = array<i64: 32, 128>}, {pipeline_mode = #tpu.pipeline_mode<synchronous>, transform_indices = @transform_2, window_bounds = array<i64: 128, 128>}, {pipeline_mode = #tpu.pipeline_mode<synchronous>, transform_indices = @transform_3, window_bounds = array<i64: 128, 128>}, {pipeline_mode = #tpu.pipeline_mode<synchronous>, transform_indices = @transform_4, window_bounds = array<i64: 128, 128>}, {pipeline_mode = #tpu.pipeline_mode<synchronous>, transform_indices = @transform_5, window_bounds = array<i64: 9, 128>}, {pipeline_mode = #tpu.pipeline_mode<synchronous>, transform_indices = @transform_6, window_bounds = array<i64: 1, 128>}, {transform_indices = @transform_7, window_bounds = array<i64: 8, 128>}]} {
    %c0 = arith.constant 0 : index
    %c0_0 = arith.constant 0 : index
    %0 = vector.load %arg1[%c0, %c0_0] : memref<8x32xf32, #tpu.memory_space<vmem>>, vector<8x32xf32>
    %c0_1 = arith.constant 0 : index
    %c0_2 = arith.constant 0 : index
    %1 = vector.load %arg6[%c0_1, %c0_2] : memref<9x128xf32, #tpu.memory_space<vmem>>, vector<1x128xf32>
    %c1 = arith.constant 1 : index
    %c0_3 = arith.constant 0 : index
    %2 = vector.load %arg6[%c1, %c0_3] : memref<9x128xf32, #tpu.memory_space<vmem>>, vector<1x128xf32>
    %c2 = arith.constant 2 : index
    %c0_4 = arith.constant 0 : index
    %3 = vector.load %arg6[%c2, %c0_4] : memref<9x128xf32, #tpu.memory_space<vmem>>, vector<1x128xf32>
    %4 = arith.truncf %0 : vector<8x32xf32> to vector<8x32xbf16>
    %c0_5 = arith.constant 0 : index
    %c0_6 = arith.constant 0 : index
    %5 = vector.load %arg2[%c0_5, %c0_6] : memref<32x128xbf16, #tpu.memory_space<vmem>>, vector<32x128xbf16>
    %cst = arith.constant dense<0.000000e+00> : vector<8x128xf32>
    %6 = tpu.matmul %4, %5, %cst {dimension_numbers = #tpu.dot_dimension_numbers<[1], [0], [0], [1], [0, 0, 1, 1], [], []>} : vector<8x32xbf16>, vector<32x128xbf16>, vector<8x128xf32> -> vector<8x128xf32>
    %7 = vector.broadcast %1 : vector<1x128xf32> to vector<8x128xf32>
    %8 = arith.addf %6, %7 : vector<8x128xf32>
    %cst_7 = arith.constant dense<0.000000e+00> : vector<8xf32>
    %9 = vector.multi_reduction <add>, %8, %cst_7 [1] : vector<8x128xf32> to vector<8xf32>
    %10 = vector.shape_cast %9 : vector<8xf32> to vector<8x1xf32>
    %cst_8 = arith.constant 3.125000e-02 : f32
    %11 = vector.broadcast %cst_8 : f32 to vector<8x1xf32>
    %12 = arith.mulf %10, %11 : vector<8x1xf32>
    %13 = arith.mulf %8, %8 : vector<8x128xf32>
    %cst_9 = arith.constant dense<0.000000e+00> : vector<8xf32>
    %14 = vector.multi_reduction <add>, %13, %cst_9 [1] : vector<8x128xf32> to vector<8xf32>
    %15 = vector.shape_cast %14 : vector<8xf32> to vector<8x1xf32>
    %cst_10 = arith.constant 3.125000e-02 : f32
    %16 = vector.broadcast %cst_10 : f32 to vector<8x1xf32>
    %17 = arith.mulf %15, %16 : vector<8x1xf32>
    %18 = arith.mulf %12, %12 : vector<8x1xf32>
    %19 = arith.subf %17, %18 : vector<8x1xf32>
    %cst_11 = arith.constant 0.000000e+00 : f32
    %20 = vector.broadcast %cst_11 : f32 to vector<8x1xf32>
    %21 = arith.maximumf %19, %20 : vector<8x1xf32>
    %22 = vector.broadcast %12 : vector<8x1xf32> to vector<8x128xf32>
    %23 = arith.subf %8, %22 : vector<8x128xf32>
    %cst_12 = arith.constant 9.99999974E-6 : f32
    %24 = vector.broadcast %cst_12 : f32 to vector<8x1xf32>
    %25 = arith.addf %21, %24 : vector<8x1xf32>
    %26 = math.rsqrt %25 : vector<8x1xf32>
    %27 = vector.broadcast %26 : vector<8x1xf32> to vector<8x128xf32>
    %28 = arith.mulf %23, %27 : vector<8x128xf32>
    %29 = vector.broadcast %2 : vector<1x128xf32> to vector<8x128xf32>
    %30 = arith.mulf %28, %29 : vector<8x128xf32>
    %31 = vector.broadcast %3 : vector<1x128xf32> to vector<8x128xf32>
    %32 = arith.addf %30, %31 : vector<8x128xf32>
    %cst_13 = arith.constant 0.000000e+00 : f32
    %33 = vector.broadcast %cst_13 : f32 to vector<8x128xf32>
    %34 = arith.maximumf %32, %33 : vector<8x128xf32>
    %c3 = arith.constant 3 : index
    %c0_14 = arith.constant 0 : index
    %35 = vector.load %arg6[%c3, %c0_14] : memref<9x128xf32, #tpu.memory_space<vmem>>, vector<1x128xf32>
    %c4 = arith.constant 4 : index
    %c0_15 = arith.constant 0 : index
    %36 = vector.load %arg6[%c4, %c0_15] : memref<9x128xf32, #tpu.memory_space<vmem>>, vector<1x128xf32>
    %c5 = arith.constant 5 : index
    %c0_16 = arith.constant 0 : index
    %37 = vector.load %arg6[%c5, %c0_16] : memref<9x128xf32, #tpu.memory_space<vmem>>, vector<1x128xf32>
    %38 = arith.truncf %34 : vector<8x128xf32> to vector<8x128xbf16>
    %c0_17 = arith.constant 0 : index
    %c0_18 = arith.constant 0 : index
    %39 = vector.load %arg3[%c0_17, %c0_18] : memref<128x128xbf16, #tpu.memory_space<vmem>>, vector<128x128xbf16>
    %cst_19 = arith.constant dense<0.000000e+00> : vector<8x128xf32>
    %40 = tpu.matmul %38, %39, %cst_19 {dimension_numbers = #tpu.dot_dimension_numbers<[1], [0], [0], [1], [0, 0, 1, 1], [], []>} : vector<8x128xbf16>, vector<128x128xbf16>, vector<8x128xf32> -> vector<8x128xf32>
    %41 = vector.broadcast %35 : vector<1x128xf32> to vector<8x128xf32>
    %42 = arith.addf %40, %41 : vector<8x128xf32>
    %cst_20 = arith.constant dense<0.000000e+00> : vector<8xf32>
    %43 = vector.multi_reduction <add>, %42, %cst_20 [1] : vector<8x128xf32> to vector<8xf32>
    %44 = vector.shape_cast %43 : vector<8xf32> to vector<8x1xf32>
    %cst_21 = arith.constant 3.125000e-02 : f32
    %45 = vector.broadcast %cst_21 : f32 to vector<8x1xf32>
    %46 = arith.mulf %44, %45 : vector<8x1xf32>
    %47 = arith.mulf %42, %42 : vector<8x128xf32>
    %cst_22 = arith.constant dense<0.000000e+00> : vector<8xf32>
    %48 = vector.multi_reduction <add>, %47, %cst_22 [1] : vector<8x128xf32> to vector<8xf32>
    %49 = vector.shape_cast %48 : vector<8xf32> to vector<8x1xf32>
    %cst_23 = arith.constant 3.125000e-02 : f32
    %50 = vector.broadcast %cst_23 : f32 to vector<8x1xf32>
    %51 = arith.mulf %49, %50 : vector<8x1xf32>
    %52 = arith.mulf %46, %46 : vector<8x1xf32>
    %53 = arith.subf %51, %52 : vector<8x1xf32>
    %cst_24 = arith.constant 0.000000e+00 : f32
    %54 = vector.broadcast %cst_24 : f32 to vector<8x1xf32>
    %55 = arith.maximumf %53, %54 : vector<8x1xf32>
    %56 = vector.broadcast %46 : vector<8x1xf32> to vector<8x128xf32>
    %57 = arith.subf %42, %56 : vector<8x128xf32>
    %cst_25 = arith.constant 9.99999974E-6 : f32
    %58 = vector.broadcast %cst_25 : f32 to vector<8x1xf32>
    %59 = arith.addf %55, %58 : vector<8x1xf32>
    %60 = math.rsqrt %59 : vector<8x1xf32>
    %61 = vector.broadcast %60 : vector<8x1xf32> to vector<8x128xf32>
    %62 = arith.mulf %57, %61 : vector<8x128xf32>
    %63 = vector.broadcast %36 : vector<1x128xf32> to vector<8x128xf32>
    %64 = arith.mulf %62, %63 : vector<8x128xf32>
    %65 = vector.broadcast %37 : vector<1x128xf32> to vector<8x128xf32>
    %66 = arith.addf %64, %65 : vector<8x128xf32>
    %cst_26 = arith.constant 0.000000e+00 : f32
    %67 = vector.broadcast %cst_26 : f32 to vector<8x128xf32>
    %68 = arith.maximumf %66, %67 : vector<8x128xf32>
    %c6 = arith.constant 6 : index
    %c0_27 = arith.constant 0 : index
    %69 = vector.load %arg6[%c6, %c0_27] : memref<9x128xf32, #tpu.memory_space<vmem>>, vector<1x128xf32>
    %c7 = arith.constant 7 : index
    %c0_28 = arith.constant 0 : index
    %70 = vector.load %arg6[%c7, %c0_28] : memref<9x128xf32, #tpu.memory_space<vmem>>, vector<1x128xf32>
    %c8 = arith.constant 8 : index
    %c0_29 = arith.constant 0 : index
    %71 = vector.load %arg6[%c8, %c0_29] : memref<9x128xf32, #tpu.memory_space<vmem>>, vector<1x128xf32>
    %72 = arith.truncf %68 : vector<8x128xf32> to vector<8x128xbf16>
    %c0_30 = arith.constant 0 : index
    %c0_31 = arith.constant 0 : index
    %73 = vector.load %arg4[%c0_30, %c0_31] : memref<128x128xbf16, #tpu.memory_space<vmem>>, vector<128x128xbf16>
    %cst_32 = arith.constant dense<0.000000e+00> : vector<8x128xf32>
    %74 = tpu.matmul %72, %73, %cst_32 {dimension_numbers = #tpu.dot_dimension_numbers<[1], [0], [0], [1], [0, 0, 1, 1], [], []>} : vector<8x128xbf16>, vector<128x128xbf16>, vector<8x128xf32> -> vector<8x128xf32>
    %75 = vector.broadcast %69 : vector<1x128xf32> to vector<8x128xf32>
    %76 = arith.addf %74, %75 : vector<8x128xf32>
    %cst_33 = arith.constant dense<0.000000e+00> : vector<8xf32>
    %77 = vector.multi_reduction <add>, %76, %cst_33 [1] : vector<8x128xf32> to vector<8xf32>
    %78 = vector.shape_cast %77 : vector<8xf32> to vector<8x1xf32>
    %cst_34 = arith.constant 3.125000e-02 : f32
    %79 = vector.broadcast %cst_34 : f32 to vector<8x1xf32>
    %80 = arith.mulf %78, %79 : vector<8x1xf32>
    %81 = arith.mulf %76, %76 : vector<8x128xf32>
    %cst_35 = arith.constant dense<0.000000e+00> : vector<8xf32>
    %82 = vector.multi_reduction <add>, %81, %cst_35 [1] : vector<8x128xf32> to vector<8xf32>
    %83 = vector.shape_cast %82 : vector<8xf32> to vector<8x1xf32>
    %cst_36 = arith.constant 3.125000e-02 : f32
    %84 = vector.broadcast %cst_36 : f32 to vector<8x1xf32>
    %85 = arith.mulf %83, %84 : vector<8x1xf32>
    %86 = arith.mulf %80, %80 : vector<8x1xf32>
    %87 = arith.subf %85, %86 : vector<8x1xf32>
    %cst_37 = arith.constant 0.000000e+00 : f32
    %88 = vector.broadcast %cst_37 : f32 to vector<8x1xf32>
    %89 = arith.maximumf %87, %88 : vector<8x1xf32>
    %90 = vector.broadcast %80 : vector<8x1xf32> to vector<8x128xf32>
    %91 = arith.subf %76, %90 : vector<8x128xf32>
    %cst_38 = arith.constant 9.99999974E-6 : f32
    %92 = vector.broadcast %cst_38 : f32 to vector<8x1xf32>
    %93 = arith.addf %89, %92 : vector<8x1xf32>
    %94 = math.rsqrt %93 : vector<8x1xf32>
    %95 = vector.broadcast %94 : vector<8x1xf32> to vector<8x128xf32>
    %96 = arith.mulf %91, %95 : vector<8x128xf32>
    %97 = vector.broadcast %70 : vector<1x128xf32> to vector<8x128xf32>
    %98 = arith.mulf %96, %97 : vector<8x128xf32>
    %99 = vector.broadcast %71 : vector<1x128xf32> to vector<8x128xf32>
    %100 = arith.addf %98, %99 : vector<8x128xf32>
    %cst_39 = arith.constant 0.000000e+00 : f32
    %101 = vector.broadcast %cst_39 : f32 to vector<8x128xf32>
    %102 = arith.maximumf %100, %101 : vector<8x128xf32>
    %103 = arith.truncf %102 : vector<8x128xf32> to vector<8x128xbf16>
    %c0_40 = arith.constant 0 : index
    %c0_41 = arith.constant 0 : index
    %104 = vector.load %arg5[%c0_40, %c0_41] : memref<128x128xbf16, #tpu.memory_space<vmem>>, vector<128x128xbf16>
    %cst_42 = arith.constant dense<0.000000e+00> : vector<8x128xf32>
    %105 = tpu.matmul %103, %104, %cst_42 {dimension_numbers = #tpu.dot_dimension_numbers<[1], [0], [0], [1], [0, 0, 1, 1], [], []>} : vector<8x128xbf16>, vector<128x128xbf16>, vector<8x128xf32> -> vector<8x128xf32>
    %c0_43 = arith.constant 0 : index
    %c0_44 = arith.constant 0 : index
    %106 = vector.load %arg7[%c0_43, %c0_44] : memref<1x128xf32, #tpu.memory_space<vmem>>, vector<1x128xf32>
    %107 = vector.broadcast %106 : vector<1x128xf32> to vector<8x128xf32>
    %108 = arith.addf %105, %107 : vector<8x128xf32>
    %c0_45 = arith.constant 0 : index
    %c0_46 = arith.constant 0 : index
    %109 = vector.load %arg8[%c0_45, %c0_46] : memref<8x128xf32, #tpu.memory_space<vmem>>, vector<8x128xf32>
    tpu.vector_store %arg8[%c0_45, %c0_46], %108 {strides = array<i32>} : memref<8x128xf32, #tpu.memory_space<vmem>>, vector<8x128xf32>,
    return
  }
  func.func @transform_0(%arg0: i32) -> (i32, i32) {
    %c0_i32 = arith.constant 0 : i32
    %c0_i32_0 = arith.constant 0 : i32
    return %arg0, %c0_i32 : i32, i32
  }
  func.func @transform_1(%arg0: i32) -> (i32, i32) {
    %c0_i32 = arith.constant 0 : i32
    %c0_i32_0 = arith.constant 0 : i32
    %c0_i32_1 = arith.constant 0 : i32
    return %c0_i32, %c0_i32_0 : i32, i32
  }
  func.func @transform_2(%arg0: i32) -> (i32, i32) {
    %c0_i32 = arith.constant 0 : i32
    %c0_i32_0 = arith.constant 0 : i32
    %c0_i32_1 = arith.constant 0 : i32
    return %c0_i32, %c0_i32_0 : i32, i32
  }
  func.func @transform_3(%arg0: i32) -> (i32, i32) {
    %c0_i32 = arith.constant 0 : i32
    %c0_i32_0 = arith.constant 0 : i32
    %c0_i32_1 = arith.constant 0 : i32
    return %c0_i32, %c0_i32_0 : i32, i32
  }
  func.func @transform_4(%arg0: i32) -> (i32, i32) {
    %c0_i32 = arith.constant 0 : i32
    %c0_i32_0 = arith.constant 0 : i32
    %c0_i32_1 = arith.constant 0 : i32
    return %c0_i32, %c0_i32_0 : i32, i32
  }
  func.func @transform_5(%arg0: i32) -> (i32, i32) {
    %c0_i32 = arith.constant 0 : i32
    %c0_i32_0 = arith.constant 0 : i32
    %c0_i32_1 = arith.constant 0 : i32
    return %c0_i32, %c0_i32_0 : i32, i32
  }
  func.func @transform_6(%arg0: i32) -> (i32, i32) {
    %c0_i32 = arith.constant 0 : i32
    %c0_i32_0 = arith.constant 0 : i32
    %c0_i32_1 = arith.constant 0 : i32
    return %c0_i32, %c0_i32_0 : i32, i32
  }
  func.func @transform_7(%arg0: i32) -> (i32, i32) {
    %c0_i32 = arith.constant 0 : i32
    %c0_i32_0 = arith.constant 0 : i32
    return %arg0, %c0_i32 : i32, i32
  }
}

</mosaic_0001>

<bundles_post_ra>
// kernel: emotion_regression_forward.1
= control target key start
LH: loop header
LB: loop body
LE: loop exit
PB: predicated region body
PF: predicated region fallthrough
CT: control target
= control target key end

     0   :  { %12 = vsyncpa [#allocation3], 0  ;;  %s931_s0 = inlined_call_operand.hbm [shape: f32[8,32], index: 0, kind: input, shape index: {}]   ;;  %s932_s1 = inlined_call_operand.hbm [shape: bf16[32,128], index: 1, kind: input, shape index: {}]   ;;  %s933_s2 = inlined_call_operand.hbm [shape: bf16[128,128], index: 2, kind: input, shape index: {}]   ;;  %s934_s3 = inlined_call_operand.hbm [shape: bf16[128,128], index: 3, kind: input, shape index: {}]   ;;  %s935_s4 = inlined_call_operand.hbm [shape: bf16[128,128], index: 4, kind: input, shape index: {}]   ;;  %s936_s5 = inlined_call_operand.hbm [shape: f32[9,128], index: 5, kind: input, shape index: {}]   ;;  %s937_s6 = inlined_call_operand.hbm [shape: f32[1,128], index: 6, kind: input, shape index: {}]   ;;  %s938_s7 = inlined_call_operand.vmem [shape: f32[8,128], index: 7, kind: output, shape index: {}]  }
   0x1   :  { %13 = vsyncpa [#allocation5], 0 }
   0x2   :  { %14 = vsyncpa [#allocation8], 0  ;;  %s31_s26 = sshll.u32 %s932_s1, 4  ;;  %s32_s26 = int_to_ptr.hbm [resolvable:$true] %s31_s26 }
   0x3   :  { %15 = vsyncpa [#allocation11], 0  ;;  %s844_s27 = smov [#allocation4]   ;;  %s57_s8 = sshll.u32 %s934_s3, 4  ;;  %s58_s8 = int_to_ptr.hbm [resolvable:$true] %s57_s8 }
   0x4   :  { %s33_s28 = sshll.u32 %s844_s27, 4  ;;  %s845_s9 = smov 64   ;;  %s34_s28 = int_to_ptr.vmem [resolvable:$true] %s33_s28 }
   0x5   :  { %s846_s10 = smov 4   ;;  %s847_s11 = smov [#allocation7]  }
   0x6   :  { %39 = dma.hbm_to_vmem [thread:$0]  %s32_s26, 256, %s34_s28, [#allocation5], %s845_s9, %s845_s9, %s846_s10  }
   0x7   :  { %s59_s12 = sshll.u32 %s847_s11, 4  ;;  %s83_s14 = sshll.u32 %s936_s5, 4  ;;  %s60_s12 = int_to_ptr.vmem [resolvable:$true] %s59_s12  ;;  %s84_s14 = int_to_ptr.hbm [resolvable:$true] %s83_s14 }
   0x8   :  { %65 = dma.hbm_to_vmem [thread:$0]  %s58_s8, 1024, %s60_s12, [#allocation8], %s845_s9, %s845_s9, %s846_s10  }
   0x9   :  { %s848_s3 = smov [#allocation10]   ;;  %s21_s18 = sshll.u32 %s931_s0, 4  ;;  %s22_s18 = int_to_ptr.hbm [resolvable:$true] %s21_s18 }
   0xa   :  { %s85_s15 = sshll.u32 %s848_s3, 4  ;;  %s849_s19 = smov 128   ;;  %s86_s15 = int_to_ptr.vmem [resolvable:$true] %s85_s15 }
   0xb   :  { %s850_s20 = smov 8   ;;  %s851_s21 = smov [#allocation2]  }
   0xc   :  { %91 = dma.hbm_to_vmem [thread:$0]  %s84_s14, 256, %s86_s15, [#allocation11], %s849_s19, %s849_s19, %s850_s20  }
   0xd   :  { %s23_s22 = sshll.u32 %s851_s21, 4  ;;  %s44_s24 = sshll.u32 %s933_s2, 4  ;;  %s24_s22 = int_to_ptr.vmem [resolvable:$true] %s23_s22  ;;  %s45_s24 = int_to_ptr.hbm [resolvable:$true] %s44_s24 }
   0xe   :  { %26 = dma.hbm_to_vmem [thread:$0]  %s22_s18, 128, %s24_s22, [#allocation3]  }
   0xf   :  { %s70_s27 = sshll.u32 %s935_s4, 4  ;;  %s852_s28 = smov [#allocation6]   ;;  %s71_s27 = int_to_ptr.hbm [resolvable:$true] %s70_s27 }
  0x10   :  { %s46_s29 = sshll.u32 %s852_s28, 4  ;;  %s853_s0 = smov [#allocation9]   ;;  %s47_s29 = int_to_ptr.vmem [resolvable:$true] %s46_s29 }
  0x11   :  { %52 = dma.hbm_to_vmem [thread:$0]  %s45_s24, 1024, %s47_s29, [#allocation5], %s845_s9, %s845_s9, %s846_s10  }
  0x12   :  { %s72_s30 = sshll.u32 %s853_s0, 4  ;;  %s97_s2 = sshll.u32 %s937_s6, 4  ;;  %s73_s30 = int_to_ptr.vmem [resolvable:$true] %s72_s30  ;;  %s98_s2 = int_to_ptr.hbm [resolvable:$true] %s97_s2 }
  0x13   :  { %78 = dma.hbm_to_vmem [thread:$0]  %s71_s27, 1024, %s73_s30, [#allocation8], %s845_s9, %s845_s9, %s846_s10  }
  0x14   :  { %s854_s4 = smov [#allocation12]  }
  0x15   :  { %s99_s12 = sshll.u32 %s854_s4, 4  ;;  %s100_s12 = int_to_ptr.vmem [resolvable:$true] %s99_s12 }
  0x16   :  { %102 = dma.hbm_to_vmem [thread:$0]  %s98_s2, 16, %s100_s12, [#allocation11]  }
  0x17   :  { %836 = dma.done.wait [#allocation3], 128  }
  0x18   :  { %837 = vsyncadd [#allocation3], 4294967168 }
  0x19   :  { %838 = dma.done.wait [#allocation5], 1280  }
  0x1a   :  { %839 = vsyncadd [#allocation5], 4294966016 }
  0x1b   :  { %840 = dma.done.wait [#allocation8], 2048  }
  0x1c   :  { %841 = vsyncadd [#allocation8], 4294965248 }
  0x1d   :  { %842 = dma.done.wait [#allocation11], 272  }
  0x1e   :  { %843 = vsyncadd [#allocation11], 4294967024  ;;  %v616_v0 = vld [vmem:[#allocation4 + $0x8] sm:$0xff]  ;;  %v615_v1 = vld [vmem:[#allocation4] sm:$0xff]  ;;  %vm154_vm0 = vcmask 261120  }
  0x1f   :  { %v132_v2 = vld [vmem:[#allocation2] sm:$0xff]  ;;  %164 = vmatpush.bf16.msra.mxu0 %v616_v0  ;;  %v652_v4 = vld [vmem:[#allocation10] ss:$0 sm:$0xff]  ;;  %v624_v9 = vld [vmem:[#allocation6 + $0x38] sm:$0xff] }
  0x20   :  { %v136_v3 = vpack.c.bf16 %v132_v2, %v132_v2  ;;  %268 = vmatpush.bf16.msra.mxu1 %v624_v9  ;;  %v623_v10 = vld [vmem:[#allocation6 + $0x30] sm:$0xff]  ;;  %v622_v11 = vld [vmem:[#allocation6 + $0x28] sm:$0xff]  ;;  %v621_v12 = vld [vmem:[#allocation6 + $0x20] sm:$0xff] }
  0x21   :  { %v620_v13 = vld [vmem:[#allocation6 + $0x18] sm:$0xff]  ;;  %v619_v14 = vld [vmem:[#allocation6 + $0x10] sm:$0xff]  ;;  %v618_v16 = vld [vmem:[#allocation6 + $0x8] sm:$0xff] }
  0x22   :  { %v617_v18 = vld [vmem:[#allocation6] sm:$0xff]  ;;  %v632_v45 = vld [vmem:[#allocation7 + $0x38] sm:$0xff]  ;;  %v631_v46 = vld [vmem:[#allocation7 + $0x30] sm:$0xff] }
  0x23   :  { %165 = vmatpush.bf16.msra.mxu0 %v615_v1  ;;  %v653_v32 = vld [vmem:[#allocation10 + $0x1] ss:$0 sm:$0xff]  ;;  %v654_v35 = vld [vmem:[#allocation10 + $0x2] ss:$0 sm:$0xff]  ;;  %v655_v40 = vld [vmem:[#allocation10 + $0x3] ss:$0 sm:$0xff]  ;;  %378 = vmatpush.bf16.msra.mxu2 %v632_v45 }
  0x24   :  { %269 = vmatpush.bf16.msra.mxu1 %v623_v10  ;;  %v630_v47 = vld [vmem:[#allocation7 + $0x28] sm:$0xff]  ;;  %v629_v48 = vld [vmem:[#allocation7 + $0x20] sm:$0xff]  ;;  %v628_v49 = vld [vmem:[#allocation7 + $0x18] sm:$0xff] }
  0x25   :  { %v627_v50 = vld [vmem:[#allocation7 + $0x10] sm:$0xff]  ;;  %v626_v52 = vld [vmem:[#allocation7 + $0x8] sm:$0xff]  ;;  %v625_v54 = vld [vmem:[#allocation7] sm:$0xff] }
  0x26   :  { %518 = vmatmul.msk.bf16.vlgmr.msra.gmra.mxu0 %vm154_vm0, %v136_v3 }
  0x27   :  { %379 = vmatpush.bf16.msra.mxu2 %v631_v46 }
  0x28   :  { %270 = vmatpush.bf16.msra.mxu1 %v622_v11 }
  0x2b   :  { %380 = vmatpush.bf16.msra.mxu2 %v630_v47 }
  0x2c   :  { %271 = vmatpush.bf16.msra.mxu1 %v621_v12  ;;  %v658_v12 = vld [vmem:[#allocation10 + $0x6] ss:$0 sm:$0xff] }
  0x2f   :  { %381 = vmatpush.bf16.msra.mxu2 %v629_v48  ;;  %v661_v48 = vld [vmem:[#allocation12] ss:$0 sm:$0xff] }
  0x30   :  { %272 = vmatpush.bf16.msra.mxu1 %v620_v13 }
  0x33   :  { %382 = vmatpush.bf16.msra.mxu2 %v628_v49 }
  0x34   :  { %273 = vmatpush.bf16.msra.mxu1 %v619_v14 }
  0x37   :  { %383 = vmatpush.bf16.msra.mxu2 %v627_v50 }
  0x38   :  { %274 = vmatpush.bf16.msra.mxu1 %v618_v16 }
  0x3b   :  { %384 = vmatpush.bf16.msra.mxu2 %v626_v52 }
  0x3c   :  { %275 = vmatpush.bf16.msra.mxu1 %v617_v18  ;;  %v639_v18 = vld [vmem:[#allocation9 + $0x30] sm:$0xff] }
  0x3f   :  { %385 = vmatpush.bf16.msra.mxu2 %v625_v54 }
  0xa3   :  { %v167_v5 = vpop.f32.mrf.mxu0 }
  0xa4   :  { %v168_v6 = vadd.f32 %v652_v4, %v167_v5  ;;  %v656_v4 = vld [vmem:[#allocation10 + $0x4] ss:$0 sm:$0xff] }
  0xa6   :  { %171 = vadd.xlane.f32.xlu0 %v168_v6  ;;  %v174_v8 = vmul.f32 %v168_v6, %v168_v6 }
  0xab   :  { %v169_v7 = vpop.f32.mrf.mxu0 }
  0xac   :  { %v657_v7 = vld [vmem:[#allocation10 + $0x5] ss:$0 sm:$0xff] }
  0xae   :  { %175 = vadd.xlane.f32.xlu0 %v174_v8 }
 0x119   :  { %v172_v15 = vpop.xlane.xlu0 %171 }
 0x11a   :  { %v173_v17 = vmul.f32 0.03125, %v172_v15 }
 0x11c   :  { %v178_v20 = vmul.f32 %v173_v17, %v173_v17  ;;  %v181_v31 = vsub.f32 %v168_v6, %v173_v17  ;;  %v640_v17 = vld [vmem:[#allocation9 + $0x38] sm:$0xff] }
 0x11d   :  { %488 = vmatpush.bf16.msra.mxu3 %v640_v17 }
 0x121   :  { %v176_v19 = vpop.xlane.xlu0 %175  ;;  %489 = vmatpush.bf16.msra.mxu3 %v639_v18 }
 0x122   :  { %v177_v21 = vmul.f32 0.03125, %v176_v19  ;;  %v638_v19 = vld [vmem:[#allocation9 + $0x28] sm:$0xff] }
 0x124   :  { %v179_v22 = vsub.f32 %v177_v21, %v178_v20  ;;  %v637_v20 = vld [vmem:[#allocation9 + $0x20] sm:$0xff]  ;;  %v636_v21 = vld [vmem:[#allocation9 + $0x18] sm:$0xff] }
 0x125   :  { %490 = vmatpush.bf16.msra.mxu3 %v638_v19 }
 0x126   :  { %v180_v23 = vmax.f32 %v179_v22, 0.0  ;;  %v635_v22 = vld [vmem:[#allocation9 + $0x10] sm:$0xff] }
 0x128   :  { %v182_v24 = vadd.f32 1e-05, %v180_v23 }
 0x129   :  { %491 = vmatpush.bf16.msra.mxu3 %v637_v20 }
 0x12a   :  { %662 = vrsqrt.f32 %v182_v24  ;;  %vm189_vm2 = vweird.f32 %v182_v24 }
 0x12d   :  { %492 = vmatpush.bf16.msra.mxu3 %v636_v21 }
 0x130   :  { %v663_v25 = vpop.eup %662 }
 0x131   :  { %v184_v26 = vmul.f32 %v663_v25, %v182_v24  ;;  %vm190_vm1 = vweird.f32 %v663_v25  ;;  %493 = vmatpush.bf16.msra.mxu3 %v635_v22  ;;  %v634_v24 = vld [vmem:[#allocation9 + $0x8] sm:$0xff] }
 0x132   :  { %vm191_vm3 = vmor %vm189_vm2, %vm190_vm1 }
 0x133   :  { %v185_v27 = vmul.f32 %v663_v25, %v184_v26  ;;  %v633_v26 = vld [vmem:[#allocation9] sm:$0xff] }
 0x135   :  { %v186_v28 = vmul.f32 0.5, %v185_v27  ;;  %494 = vmatpush.bf16.msra.mxu3 %v634_v24 }
 0x137   :  { %v187_v29 = vsub.f32 1.5, %v186_v28 }
 0x139   :  { %v188_v30 = vmul.f32 %v663_v25, %v187_v29  ;;  %495 = vmatpush.bf16.msra.mxu3 %v633_v26 }
 0x13b   :  { %v192_v33 = vsel %vm191_vm3, %v663_v25, %v188_v30 }
 0x13c   :  { %v193_v34 = vmul.f32 %v192_v33, %v181_v31 }
 0x13e   :  { %v195_v36 = vmul.f32 %v653_v32, %v193_v34 }
 0x140   :  { %v197_v37 = vadd.f32 %v654_v35, %v195_v36 }
 0x142   :  { %v198_v38 = vmax.f32 %v197_v37, 0.0 }
 0x144   :  { %v202_v39 = vpack.c.bf16 %v198_v38, %v198_v38 }
 0x146   :  { %276 = vmatmul.bf16.vlgmr.msra.gmra.mxu1 %v202_v39 }
 0x1c3   :  { %v277_v41 = vpop.f32.mrf.mxu1 }
 0x1c4   :  { %v278_v42 = vadd.f32 %v655_v40, %v277_v41  ;;  %v659_v40 = vld [vmem:[#allocation10 + $0x7] ss:$0 sm:$0xff] }
 0x1c6   :  { %281 = vadd.xlane.f32.xlu1 %v278_v42  ;;  %v284_v44 = vmul.f32 %v278_v42, %v278_v42 }
 0x1cb   :  { %v279_v43 = vpop.f32.mrf.mxu1 }
 0x1cc   :  { %v660_v43 = vld [vmem:[#allocation10 + $0x8] ss:$0 sm:$0xff] }
 0x1ce   :  { %285 = vadd.xlane.f32.xlu1 %v284_v44 }
 0x239   :  { %v282_v51 = vpop.xlane.xlu1 %281 }
 0x23a   :  { %v283_v53 = vmul.f32 0.03125, %v282_v51 }
 0x23c   :  { %v288_v56 = vmul.f32 %v283_v53, %v283_v53  ;;  %v291_v3 = vsub.f32 %v278_v42, %v283_v53 }
 0x241   :  { %v286_v55 = vpop.xlane.xlu1 %285 }
 0x242   :  { %v287_v57 = vmul.f32 0.03125, %v286_v55 }
 0x244   :  { %v289_v58 = vsub.f32 %v287_v57, %v288_v56 }
 0x246   :  { %v290_v59 = vmax.f32 %v289_v58, 0.0 }
 0x248   :  { %v292_v60 = vadd.f32 1e-05, %v290_v59 }
 0x24a   :  { %664 = vrsqrt.f32 %v292_v60  ;;  %vm299_vm5 = vweird.f32 %v292_v60 }
 0x250   :  { %v665_v61 = vpop.eup %664 }
 0x251   :  { %v294_v62 = vmul.f32 %v665_v61, %v292_v60  ;;  %vm300_vm4 = vweird.f32 %v665_v61 }
 0x252   :  { %vm301_vm6 = vmor %vm299_vm5, %vm300_vm4 }
 0x253   :  { %v295_v63 = vmul.f32 %v665_v61, %v294_v62 }
 0x255   :  { %v296_v0 = vmul.f32 0.5, %v295_v63 }
 0x257   :  { %v297_v1 = vsub.f32 1.5, %v296_v0 }
 0x259   :  { %v298_v2 = vmul.f32 %v665_v61, %v297_v1 }
 0x25b   :  { %v302_v5 = vsel %vm301_vm6, %v665_v61, %v298_v2 }
 0x25c   :  { %v303_v6 = vmul.f32 %v302_v5, %v291_v3 }
 0x25e   :  { %v305_v8 = vmul.f32 %v656_v4, %v303_v6 }
 0x260   :  { %v307_v9 = vadd.f32 %v657_v7, %v305_v8 }
 0x262   :  { %v308_v10 = vmax.f32 %v307_v9, 0.0 }
 0x264   :  { %v312_v11 = vpack.c.bf16 %v308_v10, %v308_v10 }
 0x266   :  { %386 = vmatmul.bf16.vlgmr.msra.gmra.mxu2 %v312_v11 }
 0x2e9   :  { %v387_v13 = vpop.f32.mrf.mxu2 }
 0x2ea   :  { %v388_v14 = vadd.f32 %v658_v12, %v387_v13 }
 0x2ec   :  { %391 = vadd.xlane.f32.xlu2 %v388_v14  ;;  %v394_v16 = vmul.f32 %v388_v14, %v388_v14 }
 0x2f1   :  { %v389_v15 = vpop.f32.mrf.mxu2 }
 0x2f4   :  { %395 = vadd.xlane.f32.xlu2 %v394_v16 }
 0x35f   :  { %v392_v23 = vpop.xlane.xlu2 %391 }
 0x360   :  { %v393_v25 = vmul.f32 0.03125, %v392_v23 }
 0x362   :  { %v398_v28 = vmul.f32 %v393_v25, %v393_v25  ;;  %v401_v39 = vsub.f32 %v388_v14, %v393_v25 }
 0x367   :  { %v396_v27 = vpop.xlane.xlu2 %395 }
 0x368   :  { %v397_v29 = vmul.f32 0.03125, %v396_v27 }
 0x36a   :  { %v399_v30 = vsub.f32 %v397_v29, %v398_v28 }
 0x36c   :  { %v400_v31 = vmax.f32 %v399_v30, 0.0 }
 0x36e   :  { %v402_v32 = vadd.f32 1e-05, %v400_v31 }
 0x370   :  { %666 = vrsqrt.f32 %v402_v32  ;;  %vm409_vm8 = vweird.f32 %v402_v32 }
 0x376   :  { %v667_v33 = vpop.eup %666 }
 0x377   :  { %v404_v34 = vmul.f32 %v667_v33, %v402_v32  ;;  %vm410_vm7 = vweird.f32 %v667_v33 }
 0x378   :  { %vm411_vm9 = vmor %vm409_vm8, %vm410_vm7 }
 0x379   :  { %v405_v35 = vmul.f32 %v667_v33, %v404_v34 }
 0x37b   :  { %v406_v36 = vmul.f32 0.5, %v405_v35 }
 0x37d   :  { %v407_v37 = vsub.f32 1.5, %v406_v36 }
 0x37f   :  { %v408_v38 = vmul.f32 %v667_v33, %v407_v37 }
 0x381   :  { %v412_v41 = vsel %vm411_vm9, %v667_v33, %v408_v38 }
 0x382   :  { %v413_v42 = vmul.f32 %v412_v41, %v401_v39 }
 0x384   :  { %v415_v44 = vmul.f32 %v659_v40, %v413_v42 }
 0x386   :  { %v417_v45 = vadd.f32 %v660_v43, %v415_v44 }
 0x388   :  { %v418_v46 = vmax.f32 %v417_v45, 0.0 }
 0x38a   :  { %v419_v47 = vpack.c.bf16 %v418_v46, %v418_v46 }
 0x38c   :  { %496 = vmatmul.bf16.vlgmr.msra.gmra.mxu3 %v419_v47 }
 0x40f   :  { %v497_v49 = vpop.f32.mrf.mxu3 }
 0x410   :  { %v498_v50 = vadd.f32 %v661_v48, %v497_v49 }
 0x412   :  { %501 = vst [vmem:[%s938_s7] sm:$0xff] %v498_v50 }
 0x417   :  { %v499_v51 = vpop.f32.mrf.mxu3 }
 0x418   :  { %506 = vsyncpa [#allocation3], 1 }
 0x419   :  { %507 = vsyncpa [#allocation5], 1 }
 0x41a   :  { %508 = vsyncpa [#allocation8], 1 }
 0x41b   :  { %509 = vsyncpa [#allocation11], 1 }

</bundles_post_ra>
